<compile_context>
chip_gen: v6e
topology: v6e:2x2x1
jax: 0.10.0
libtpu: 0.0.40
codegen_flags: <defaults>
</compile_context>

<pallas_src>
import functools

import jax
import jax.numpy as jnp
from jax import lax
from jax.experimental import pallas as pl
from jax.experimental.pallas import tpu as pltpu


# Contract the last dim of both operands: X @ Y.T without materializing Y.T.
_GRAM_DIMS = (((1,), (1,)), ((), ()))
_LANE = 128
_DEFAULT_BUDGET = 20 * 1024 * 1024   # resident-VMEM target (fits every chip w/ 32 MiB limit)
_TK_MAX = 4096


def _round_up(x, m):
    return ((x + m - 1) // m) * m


def _plan(M, K, *, streams, acc_copies, in_itemsize, budget, n_split=None,
          tk_req=None, tk_max=_TK_MAX):
    """Pick (n_j, M_pad, K_pad, tk, est_vmem_bytes) for the slab kernels.

    streams     : number of bf16 feature arrays DMA'd per step (double-buffered).
    acc_copies  : number of resident f32 (M_pad, tn) stripes to budget for.
    """
    def mpad_of(nj):
        # nj == 1: the M block equals the full dim -> no (8,128) constraint and
        # no HBM padding copy of the feature map.
        return M if nj == 1 else _round_up(M, _LANE * nj)

    def usage(nj, kpad_tk):
        _, tk = kpad_tk
        mpad = mpad_of(nj)
        tn = mpad // nj
        slabs = 2 * streams * mpad * tk * in_itemsize     # double-buffered input slabs
        acc = acc_copies * mpad * tn * 4                  # resident f32 output / scratch
        return slabs + acc

    # K tiling candidates, best (fewest steps, least padding) first.
    if tk_req is not None:
        tk = min(int(tk_req), K)
        if tk < K:
            tk = max(_LANE, _round_up(tk, _LANE))
            kpad = _round_up(K, tk)
        else:
            kpad = K
        k_cands = [(kpad, tk)]
    else:
        k_cands = []
        if K <= tk_max:
            k_cands.append((K, K))                        # whole-K slab: 1 step, no pad
        kpad = _round_up(K, _LANE)
        units = kpad // _LANE
        for d in range(min(units, tk_max // _LANE), 0, -1):
            if units % d == 0:                            # tk divides K_pad exactly
                k_cands.append((kpad, d * _LANE))

    nj_cands = [int(n_split)] if n_split is not None else [1, 2, 4, 8]
    for nj in nj_cands:
        for cand in k_cands:
            if usage(nj, cand) <= budget:
                return nj, mpad_of(nj), cand[0], cand[1], usage(nj, cand)
    nj = nj_cands[-1]
    cand = k_cands[-1]
    return nj, mpad_of(nj), cand[0], cand[1], usage(nj, cand)


def _vmem_limit(usage_bytes):
    # Raise the scoped-VMEM limit explicitly (v5e default ~16 MiB); never exceed
    # v7x physical (64 MiB).
    return int(min(64 << 20, max(32 << 20, usage_bytes + (8 << 20))))


# --------------------------------------------------------------------------
# Gram kernel (standalone, matches the PyTorch Gram module forward).
# --------------------------------------------------------------------------
def _gram_slab_kernel(x_ref, o_ref, *, scale, tn, n_j):
    k = pl.program_id(1)

    @pl.when(k == 0)
    def _():
        o_ref[...] = jnp.zeros_like(o_ref)

    xs = x_ref[...]                                     # (M_pad, tk) bf16 slab, read once per K step
    if n_j == 1:
        rhs = xs
    else:
        j = pl.program_id(0)
        rhs = x_ref[pl.ds(pl.multiple_of(j * tn, _LANE), tn), :]

    # X @ X.T via dot_general contracting the last dims (no transpose op);
    # bf16 operands, f32 MXU accumulation directly into the resident output stripe.
    o_ref[...] += lax.dot_general(xs, rhs, _GRAM_DIMS,
                                  preferred_element_type=jnp.float32)

    @pl.when(k == pl.num_programs(1) - 1)
    def _():
        o_ref[...] *= scale


def gram(x, *, mxu_dtype=jnp.bfloat16, vmem_budget=_DEFAULT_BUDGET,
         n_split=None, tk=None):
    """Pallas TPU Gram: (x.view(a*b, c*d) @ itself.T) / (a*b*c*d), f32 output."""
    a, b, c, d = x.shape
    M, K = a * b, c * d
    scale = 1.0 / float(a * b * c * d)

    feature = x.reshape(M, K)                           # torch .view(a*b, c*d)
    if mxu_dtype is not None and feature.dtype != mxu_dtype:
        feature = feature.astype(mxu_dtype)

    n_j, M_pad, K_pad, tk_, usage = _plan(
        M, K, streams=1, acc_copies=2, in_itemsize=feature.dtype.itemsize,
        budget=vmem_budget, n_split=n_split, tk_req=tk)

    if (M_pad != M) or (K_pad != K):
        # Zero padding is exact for X @ X.T; only needed when K must be tiled
        # (and is not already a multiple of 128) or when the j axis is split.
        feature = jnp.pad(feature, ((0, M_pad - M), (0, K_pad - K)))

    tn = M_pad // n_j
    grid = (n_j, K_pad // tk_)                          # K (reduction) innermost

    out = pl.pallas_call(
        functools.partial(_gram_slab_kernel, scale=scale, tn=tn, n_j=n_j),
        out_shape=jax.ShapeDtypeStruct((M_pad, M_pad), jnp.float32),
        grid_spec=pltpu.PrefetchScalarGridSpec(
            num_scalar_prefetch=0,
            grid=grid,
            in_specs=[pl.BlockSpec((M_pad, tk_), lambda j, k: (0, k))],
            out_specs=pl.BlockSpec((M_pad, tn), lambda j, k: (0, j)),
        ),
        compiler_params=pltpu.CompilerParams(
            dimension_semantics=("parallel", "arbitrary"),
            vmem_limit_bytes=_vmem_limit(usage),
        ),
    )(feature)

    if M_pad != M:
        out = out[:M, :M]     # padded rows give exactly-zero Gram entries
    return out


# --------------------------------------------------------------------------
# Fused per-level style loss: mean((gram(fx) - gram(fy))**2) without writing
# either Gram to HBM.
# --------------------------------------------------------------------------
def _style_mse_kernel(x_ref, y_ref, o_ref, acc_ref, *, scale, inv_m2, tn, n_j):
    j = pl.program_id(0)
    k = pl.program_id(1)

    @pl.when(jnp.logical_and(j == 0, k == 0))
    def _():
        o_ref[...] = jnp.zeros_like(o_ref)

    @pl.when(k == 0)
    def _():
        acc_ref[...] = jnp.zeros_like(acc_ref)

    xs = x_ref[...]
    ys = y_ref[...]
    if n_j == 1:
        xr, yr = xs, ys
    else:
        start = pl.multiple_of(j * tn, _LANE)
        xr = x_ref[pl.ds(start, tn), :]
        yr = y_ref[pl.ds(start, tn), :]

    # The Gram difference is linear in the K-partials, so one f32 stripe suffices.
    acc_ref[...] += (
        lax.dot_general(xs, xr, _GRAM_DIMS, preferred_element_type=jnp.float32)
        - lax.dot_general(ys, yr, _GRAM_DIMS, preferred_element_type=jnp.float32)
    )

    @pl.when(k == pl.num_programs(1) - 1)
    def _():
        diff = acc_ref[...] * scale
        o_ref[...] += jnp.sum(diff * diff, keepdims=True) * inv_m2


def style_mse(fx, fy, *, mxu_dtype=jnp.bfloat16, vmem_budget=_DEFAULT_BUDGET,
              n_split=None, tk=None):
    """mean((gram(fx) - gram(fy))**2) as a single fused Pallas kernel (f32 scalar)."""
    assert fx.shape == fy.shape, (fx.shape, fy.shape)
    a, b, c, d = fx.shape
    M, K = a * b, c * d
    scale = 1.0 / float(a * b * c * d)
    inv_m2 = 1.0 / float(M * M)

    X = fx.reshape(M, K)
    Y = fy.reshape(M, K)
    if mxu_dtype is not None:
        X = X.astype(mxu_dtype)
        Y = Y.astype(mxu_dtype)

    n_j, M_pad, K_pad, tk_, usage = _plan(
        M, K, streams=2, acc_copies=1, in_itemsize=X.dtype.itemsize,
        budget=vmem_budget, n_split=n_split, tk_req=tk)

    if (M_pad != M) or (K_pad != K):
        pad = ((0, M_pad - M), (0, K_pad - K))
        X = jnp.pad(X, pad)   # zero padding -> zero Gram rows in BOTH Grams -> zero diff
        Y = jnp.pad(Y, pad)

    tn = M_pad // n_j
    grid = (n_j, K_pad // tk_)

    out = pl.pallas_call(
        functools.partial(_style_mse_kernel, scale=scale, inv_m2=inv_m2,
                          tn=tn, n_j=n_j),
        out_shape=jax.ShapeDtypeStruct((1, 1), jnp.float32),
        grid_spec=pltpu.PrefetchScalarGridSpec(
            num_scalar_prefetch=0,
            grid=grid,
            in_specs=[pl.BlockSpec((M_pad, tk_), lambda j, k: (0, k)),
                      pl.BlockSpec((M_pad, tk_), lambda j, k: (0, k))],
            out_specs=pl.BlockSpec((1, 1), lambda j, k: (0, 0)),
            scratch_shapes=[pltpu.VMEM((M_pad, tn), jnp.float32)],
        ),
        compiler_params=pltpu.CompilerParams(
            # The (1,1) accumulator is revisited across j -> keep both axes serial.
            dimension_semantics=("arbitrary", "arbitrary"),
            vmem_limit_bytes=_vmem_limit(usage),
        ),
    )(X, Y)
    return out[0, 0]


# --------------------------------------------------------------------------
# VGGLoss.forward composition over precomputed VGG features (h_relu1..h_relu5).
# --------------------------------------------------------------------------
_VGG_WEIGHTS = (1.0 / 32, 1.0 / 16, 1.0 / 8, 1.0, 1.0)


def vgg_loss_from_features(x, y, x_feats, y_feats):
    styleloss = 0.0
    for w, fxi, fyi in zip(_VGG_WEIGHTS, x_feats, y_feats):
        styleloss = styleloss + w * style_mse(fxi, fyi)          # fused Gram + MSE
    contentloss = jnp.mean(jnp.abs(x_feats[3].astype(jnp.float32)
                                   - y_feats[3].astype(jnp.float32)))   # nn.L1Loss
    l1 = jnp.mean(jnp.abs(x.astype(jnp.float32) - y.astype(jnp.float32)))
    return l1 + contentloss + 100.0 * styleloss


# --------------------------------------------------------------------------
# References (pure JAX, same bf16 MXU feed) for correctness checks.
# --------------------------------------------------------------------------
def gram_ref(x, mxu_dtype=jnp.bfloat16):
    a, b, c, d = x.shape
    f = x.reshape(a * b, c * d)
    if mxu_dtype is not None:
        f = f.astype(mxu_dtype)
    g = jnp.dot(f, f.T, preferred_element_type=jnp.float32)
    return g / (a * b * c * d)


def style_mse_ref(fx, fy, mxu_dtype=jnp.bfloat16):
    return jnp.mean((gram_ref(fx, mxu_dtype) - gram_ref(fy, mxu_dtype)) ** 2)


def vgg_loss_ref(x, y, x_feats, y_feats):
    style = 0.0
    for w, fxi, fyi in zip(_VGG_WEIGHTS, x_feats, y_feats):
        style = style + w * style_mse_ref(fxi, fyi)
    content = jnp.mean(jnp.abs(x_feats[3] - y_feats[3]))
    return jnp.mean(jnp.abs(x - y)) + content + 100.0 * style


if __name__ == "__main__":
    key = jax.random.PRNGKey(0)

    # 1) Gram on a small NCHW input (auto plan: whole-K slab, single grid step).
    a, b, c, d = 2, 4, 16, 16
    k0, key = jax.random.split(key)
    x = jax.random.normal(k0, (a, b, c, d), dtype=jnp.float32)
    out = jax.block_until_ready(gram(x))
    ref = gram_ref(x)
    assert out.shape == (a * b, a * b), out.shape
    assert jnp.allclose(out, ref, atol=1e-5, rtol=1e-5), float(jnp.max(jnp.abs(out - ref)))

    # 2) Forced multi-K-step accumulation and forced column split
    #    (exercises padded M, the dynamic RHS stripe slice and the [:M,:M] crop).
    out_f = jax.block_until_ready(gram(x, tk=128, n_split=2))
    assert out_f.shape == (a * b, a * b), out_f.shape
    assert jnp.allclose(out_f, ref, atol=1e-5, rtol=1e-5), float(jnp.max(jnp.abs(out_f - ref)))

    # 3) Non-128-multiple spatial size (VGG 14x14-style map): whole-K slab, no padding.
    k1, key = jax.random.split(key)
    x2 = jax.random.normal(k1, (1, 8, 14, 14), dtype=jnp.float32)
    out2 = jax.block_until_ready(gram(x2))
    ref2 = gram_ref(x2)
    assert jnp.allclose(out2, ref2, atol=1e-5, rtol=1e-5), float(jnp.max(jnp.abs(out2 - ref2)))

    # 4) Fused style-MSE kernel (auto plan and forced split / K tiling).
    k2, k3, key = jax.random.split(key, 3)
    fx = jax.random.normal(k2, (2, 8, 16, 16), dtype=jnp.float32)
    fy = jax.random.normal(k3, (2, 8, 16, 16), dtype=jnp.float32)
    sm_ref = style_mse_ref(fx, fy)
    sm = jax.block_until_ready(style_mse(fx, fy))
    assert jnp.allclose(sm, sm_ref, atol=1e-6, rtol=1e-3), (float(sm), float(sm_ref))
    sm2 = jax.block_until_ready(style_mse(fx, fy, n_split=2, tk=128))
    assert jnp.allclose(sm2, sm_ref, atol=1e-6, rtol=1e-3), (float(sm2), float(sm_ref))

    # 5) Full VGGLoss composition on a small fake 5-level feature pyramid.
    shapes = [
        (2, 4, 16, 16),
        (2, 8, 8, 8),
        (2, 8, 8, 8),
        (2, 16, 4, 4),
        (2, 16, 4, 4),
    ]
    keys = jax.random.split(key, 2 * len(shapes) + 2)
    x_feats = [jax.random.normal(keys[i], s, dtype=jnp.float32)
               for i, s in enumerate(shapes)]
    y_feats = [jax.random.normal(keys[len(shapes) + i], s, dtype=jnp.float32)
               for i, s in enumerate(shapes)]
    xi = jax.random.normal(keys[-2], (2, 3, 16, 16), dtype=jnp.float32)
    yi = jax.random.normal(keys[-1], (2, 3, 16, 16), dtype=jnp.float32)

    loss = jax.block_until_ready(vgg_loss_from_features(xi, yi, x_feats, y_feats))
    loss_ref = vgg_loss_ref(xi, yi, x_feats, y_feats)
    assert jnp.allclose(loss, loss_ref, atol=1e-4, rtol=1e-4), (float(loss), float(loss_ref))

    print("KERNEL_OK")
</pallas_src>

<mosaic_0001>
module attributes {stable_mosaic.version = 11 : i64} {
  func.func @_gram_slab_kernel(%arg0: i32, %arg1: i32, %arg2: memref<8x256xbf16, #tpu.memory_space<vmem>>, %arg3: memref<8x8xf32, #tpu.memory_space<vmem>>) attributes {dimension_semantics = [#tpu.dimension_semantics<parallel>, #tpu.dimension_semantics<arbitrary>], iteration_bounds = array<i64: 1, 1>, scalar_prefetch = 0 : i64, scratch_operands = 0 : i64, tpu.core_type = #tpu.core_type<tc>, window_params = [{transform_indices = @transform_0, window_bounds = array<i64: 8, 256>}, {transform_indices = @transform_1, window_bounds = array<i64: 8, 8>}]} {
    %c0_i32 = arith.constant 0 : i32
    %0 = arith.cmpi eq, %arg1, %c0_i32 : i32
    %1 = arith.extui %0 : i1 to i32
    %c0_i32_0 = arith.constant 0 : i32
    %2 = arith.cmpi ne, %1, %c0_i32_0 : i32
    scf.if %2 {
      %cst_8 = arith.constant 0.000000e+00 : f32
      %11 = vector.broadcast %cst_8 : f32 to vector<8x8xf32>
      %c0_9 = arith.constant 0 : index
      %c0_10 = arith.constant 0 : index
      %12 = vector.load %arg3[%c0_9, %c0_10] : memref<8x8xf32, #tpu.memory_space<vmem>>, vector<8x8xf32>
      tpu.vector_store %arg3[%c0_9, %c0_10], %11 {strides = array<i32>} : memref<8x8xf32, #tpu.memory_space<vmem>>, vector<8x8xf32>,
    } else {
    }
    %c0 = arith.constant 0 : index
    %c0_1 = arith.constant 0 : index
    %3 = vector.load %arg2[%c0, %c0_1] : memref<8x256xbf16, #tpu.memory_space<vmem>>, vector<8x256xbf16>
    %c0_2 = arith.constant 0 : index
    %c0_3 = arith.constant 0 : index
    %4 = vector.load %arg3[%c0_2, %c0_3] : memref<8x8xf32, #tpu.memory_space<vmem>>, vector<8x8xf32>
    %cst = arith.constant dense<0.000000e+00> : vector<8x8xf32>
    %5 = tpu.matmul %3, %3, %cst {dimension_numbers = #tpu.dot_dimension_numbers<[1], [1], [0], [0], [0, 0, 1, 0], [], []>} : vector<8x256xbf16>, vector<8x256xbf16>, vector<8x8xf32> -> vector<8x8xf32>
    %6 = arith.addf %4, %5 : vector<8x8xf32>
    %c0_4 = arith.constant 0 : index
    %c0_5 = arith.constant 0 : index
    %7 = vector.load %arg3[%c0_4, %c0_5] : memref<8x8xf32, #tpu.memory_space<vmem>>, vector<8x8xf32>
    tpu.vector_store %arg3[%c0_4, %c0_5], %6 {strides = array<i32>} : memref<8x8xf32, #tpu.memory_space<vmem>>, vector<8x8xf32>,
    %c0_i32_6 = arith.constant 0 : i32
    %8 = arith.cmpi eq, %arg1, %c0_i32_6 : i32
    %9 = arith.extui %8 : i1 to i32
    %c0_i32_7 = arith.constant 0 : i32
    %10 = arith.cmpi ne, %9, %c0_i32_7 : i32
    scf.if %10 {
      %c0_8 = arith.constant 0 : index
      %c0_9 = arith.constant 0 : index
      %11 = vector.load %arg3[%c0_8, %c0_9] : memref<8x8xf32, #tpu.memory_space<vmem>>, vector<8x8xf32>
      %cst_10 = arith.constant 4.8828125E-4 : f32
      %12 = vector.broadcast %cst_10 : f32 to vector<8x8xf32>
      %13 = arith.mulf %11, %12 : vector<8x8xf32>
      %c0_11 = arith.constant 0 : index
      %c0_12 = arith.constant 0 : index
      %14 = vector.load %arg3[%c0_11, %c0_12] : memref<8x8xf32, #tpu.memory_space<vmem>>, vector<8x8xf32>
      tpu.vector_store %arg3[%c0_11, %c0_12], %13 {strides = array<i32>} : memref<8x8xf32, #tpu.memory_space<vmem>>, vector<8x8xf32>,
    } else {
    }
    return
  }
  func.func @transform_0(%arg0: i32, %arg1: i32) -> (i32, i32) {
    %c0_i32 = arith.constant 0 : i32
    %c0_i32_0 = arith.constant 0 : i32
    return %c0_i32, %arg1 : i32, i32
  }
  func.func @transform_1(%arg0: i32, %arg1: i32) -> (i32, i32) {
    %c0_i32 = arith.constant 0 : i32
    %c0_i32_0 = arith.constant 0 : i32
    return %c0_i32, %arg0 : i32, i32
  }
}

</mosaic_0001>

<bundles_post_ra>
// kernel: tpu_custom_call.1
= control target key start
LH: loop header
LB: loop body
LE: loop exit
PB: predicated region body
PF: predicated region fallthrough
CT: control target
= control target key end

     0   :  { %6 = vsyncpa [#allocation3], 0  ;;  %s174_s0 = inlined_call_operand.hbm [shape: bf16[8,256], index: 0, kind: input, shape index: {}]   ;;  %s175_s1 = inlined_call_operand.hbm [shape: f32[8,8], index: 1, kind: output, shape index: {}]  }
   0x1   :  { %7 = vsyncpa [#allocation4], 0  ;;  %s152_s6 = smov [#allocation2]  }
   0x2   :  { %s14_s7 = sshll.u32 %s152_s6, 4  ;;  %s15_s7 = int_to_ptr.vmem [resolvable:$true] %s14_s7 }
   0x3   :  { %s116_s8 = scalar_lea.vmem %s15_s7, 128  ;;  %p121_p1 = scmp.lt.s32.totalorder %s15_s7, %s15_s7 }
   0x4   :  { %p117_p0 = scmp.ne.s32.totalorder %s15_s7, %s116_s8  ;;  %p122_p2 = scmp.lt.s32.totalorder %s116_s8, %s116_s8 }
   0x6   :  { %p123_p3 = por %p122_p2, %p121_p1 }
   0x8   :  { %p124_p4 = pnand %p123_p3, %p117_p0 }
   0xa   :  { %127 = shalt.err (!%p124_p4)
}
   0xb   :  { %17 = dma.hbm_to_vmem [thread:$0]  %s174_s0, 128, %s15_s7, [#allocation3]  }
   0xc   :  { %148 = dma.done.wait [#allocation3], 128  }
   0xd   :  { %149 = vsyncadd [#allocation3], 4294967168  ;;  %vm26_vm0 = vcmask 64512   ;;  %v153_v0 = vmov 0.0   ;;  %v28_v1 = vld [vmem:[#allocation2] sm:$0xff]  ;;  %s154_s0 = smov [#allocation5]  }
   0xe   :  { %27 = vst.msk [vmem:[#allocation5] sm:$0xff] %vm26_vm0, %v153_v0  ;;  %v102_v2 = vcombine.high %v28_v1, %v28_v1  ;;  %v101_v3 = vcombine.low %v28_v1, %v28_v1  ;;  %s92_s11 = sshll.u32 %s154_s0, 4  ;;  %s93_s11 = int_to_ptr.vmem [resolvable:$true] %s92_s11 }
   0xf   :  { %s128_s12 = scalar_lea.vmem %s93_s11, 128  ;;  %p133_p6 = scmp.lt.s32.totalorder %s93_s11, %s93_s11 }
  0x10   :  { %51 = vmatprep.subr.bf16.mxu0 %v102_v2  ;;  %69 = vmatprep.mubr.bf16.mxu0 %v102_v2  ;;  %p129_p5 = scmp.ne.s32.totalorder %s93_s11, %s128_s12  ;;  %p134_p7 = scmp.lt.s32.totalorder %s128_s12, %s128_s12 }
  0x11   :  { %52 = vmatpush1.bf16.xpose.msra.mxu0 %v101_v3 }
  0x12   :  { %p135_p8 = por %p134_p7, %p133_p6 }
  0x14   :  { %p136_p9 = pnand %p135_p8, %p129_p5 }
  0x15   :  { %v29_v4 = vld [vmem:[#allocation5] sm:$0xff] }
  0x18   :  { %70 = vmatmul.mubr.bf16.vlgmr.msra.gmra.mxu0 %v101_v3 }
  0xd8   :  { %v71_v5 = vpop.f32.mrf.mxu0 }
  0xd9   :  { %v77_v6 = vadd.f32 %v71_v5, %v29_v4 }
  0xda   :  { %v73_v7 = vpop.f32.mrf.mxu0 }
  0xdb   :  { %79 = vst.msk [vmem:[#allocation5] sm:$0xff] %vm26_vm0, %v77_v6 }
  0xdc   :  { %v74_v8 = vpop.f32.mrf.mxu0 }
  0xde   :  { %v75_v9 = vpop.f32.mrf.mxu0 }
  0xe2   :  { %v83_v10 = vld [vmem:[#allocation5] sm:$0xff] }
  0xe3   :  { %v84_v11 = vmul.f32 0.00048828125, %v83_v10 }
  0xe5   :  { %85 = vst.msk [vmem:[#allocation5] sm:$0xff] %vm26_vm0, %v84_v11 }
  0xe6   :  { %139 = shalt.err (!%p136_p9)
}
  0xe7   :  { %95 = dma.vmem_to_hbm [thread:$0]  %s93_s11, 128, %s175_s1, [#allocation4]  }
  0xe8   :  { %150 = dma.done.wait [#allocation4], 128  }
  0xe9   :  { %151 = vsyncadd [#allocation4], 4294967168 }
  0xea   :  { %99 = vsyncpa [#allocation3], 1 }
  0xeb   :  { %100 = vsyncpa [#allocation4], 1 }

</bundles_post_ra>
